<compile_context>
chip_gen: v5e
topology: v5e:2x2
jax: 0.10.0
libtpu: 0.0.40
codegen_flags: <defaults>
</compile_context>

<pallas_src>
import functools

import jax
import jax.numpy as jnp
from jax.experimental import pallas as pl
from jax.experimental.pallas import tpu as pltpu


def _round_up(x, m):
    return ((x + m - 1) // m) * m


def _bce_mean_kernel(p_ref, y_ref, out_ref, acc_ref, *,
                     total_elems, tile_b, bsz, needs_mask):
    """Per-tile binary cross entropy, accumulated into a lane-wide VMEM vector."""
    i = pl.program_id(0)

    @pl.when(i == 0)
    def _():
        acc_ref[...] = jnp.zeros_like(acc_ref)

    p = p_ref[...].astype(jnp.float32)
    y = y_ref[...].astype(jnp.float32)

    # PyTorch F.binary_cross_entropy clamps log terms at -100. Two-log path kept
    # so soft (non-0/1) targets remain correct.
    log_p = jnp.maximum(jnp.log(p), jnp.float32(-100.0))
    log_1mp = jnp.maximum(jnp.log(1.0 - p), jnp.float32(-100.0))
    per_elem = -(y * log_p + (1.0 - y) * log_1mp)

    if needs_mask:
        # Zero out rows beyond the real batch (tail tile / 8-row padding).
        row = i * tile_b + jax.lax.broadcasted_iota(jnp.int32, per_elem.shape, 0)
        per_elem = jnp.where(row < bsz, per_elem, jnp.float32(0.0))

    # VPU-friendly per-step accumulate: reduce only the sublane (batch) axis,
    # keep the 128-lane axis intact. No scalar round trip per step.
    acc_ref[...] += jnp.sum(per_elem, axis=0, keepdims=True)

    @pl.when(i == pl.num_programs(0) - 1)
    def _():
        # Single cross-lane reduce + scalar store, paid once.
        out_ref[0, 0] = jnp.sum(acc_ref[...]) / jnp.float32(total_elems)


def bce_mean_pallas(probs, labels, *, tile_b=None):
    """mean(BCE(probs, labels)) via a Pallas TPU kernel. probs/labels: (bsz, num_labels)."""
    assert probs.shape == labels.shape and probs.ndim == 2
    bsz, num_labels = probs.shape

    # Auto-size the batch tile: big enough to hide per-step overhead, small
    # enough that 2 inputs x 2 pipeline buffers stay well under the v7x VMEM
    # budget (~16 MiB total with the 4 MiB/buffer cap below).
    itemsize = max(jnp.dtype(probs.dtype).itemsize, jnp.dtype(labels.dtype).itemsize)
    bytes_per_row = max(num_labels * itemsize, 1)
    if tile_b is None:
        budget_rows = max(8, (4 * 1024 * 1024) // bytes_per_row)
        tile_b = min(1024, budget_rows)
    tile_b = max(8, (tile_b // 8) * 8)          # sublane-aligned
    tile_b = min(tile_b, _round_up(bsz, 8))     # don't grossly exceed the batch

    grid = (pl.cdiv(bsz, tile_b),)
    needs_mask = (bsz % tile_b) != 0

    kernel = functools.partial(
        _bce_mean_kernel,
        total_elems=bsz * num_labels,
        tile_b=tile_b,
        bsz=bsz,
        needs_mask=needs_mask,
    )

    out = pl.pallas_call(
        kernel,
        out_shape=jax.ShapeDtypeStruct((1, 1), jnp.float32),
        grid_spec=pltpu.PrefetchScalarGridSpec(
            num_scalar_prefetch=0,
            grid=grid,
            in_specs=[
                pl.BlockSpec((tile_b, num_labels), lambda i: (i, 0)),
                pl.BlockSpec((tile_b, num_labels), lambda i: (i, 0)),
            ],
            out_specs=pl.BlockSpec(memory_space=pltpu.MemorySpace.SMEM),
            scratch_shapes=[pltpu.VMEM((1, num_labels), jnp.float32)],
        ),
        compiler_params=pltpu.CompilerParams(
            dimension_semantics=("arbitrary",),  # reduction over batch tiles
        ),
    )(probs, labels)
    return out[0, 0]


class EventDetectionLossPallas:
    """JAX/Pallas port of EventDetectionLoss (forward only)."""

    def __init__(self, pref=2):
        self.pref = float(pref)

    def __call__(self, logits, labels):
        # torch .squeeze() removes all size-1 dims; BCE then requires the result
        # to match labels' shape, so reshape back to labels.shape. This also
        # avoids the bsz==1 collapse-to-1D pitfall of a blanket squeeze.
        reshaped_result = jnp.reshape(jnp.squeeze(logits), labels.shape)

        # pos_weight is computed but never used by the original forward (dead code).
        # TODO(synk): tools.PosPrefWeight source not provided; it does not affect the loss.
        pos_weight = labels * self.pref + (1.0 - labels)
        del pos_weight

        # Hot path: elementwise BCE + mean reduction, in the Pallas kernel.
        # Inputs are passed in their native dtype; fp32 compute happens in-kernel.
        return bce_mean_pallas(reshaped_result, labels)


if __name__ == "__main__":
    key = jax.random.PRNGKey(0)
    k1, k2 = jax.random.split(key)

    bsz, num_labels = 16, 128  # small shapes consistent with (bsz, num_labels)

    # logits here are already probabilities (the torch module applies plain BCE).
    logits = jax.nn.sigmoid(jax.random.normal(k1, (bsz, num_labels), jnp.float32))
    labels = (jax.random.uniform(k2, (bsz, num_labels)) > 0.5).astype(jnp.float32)

    module = EventDetectionLossPallas(pref=2)
    loss = jax.block_until_ready(module(logits, labels))

    # Pure-JAX reference check (same clamped-log BCE, mean reduction).
    def ref_bce(p, y):
        log_p = jnp.maximum(jnp.log(p), -100.0)
        log_1mp = jnp.maximum(jnp.log(1.0 - p), -100.0)
        return jnp.mean(-(y * log_p + (1.0 - y) * log_1mp))

    ref = ref_bce(logits, labels)
    assert jnp.allclose(loss, ref, rtol=1e-5, atol=1e-5), (loss, ref)

    # Also exercise the non-divisible / tail-masked path (bsz not a multiple of 8).
    k3, k4 = jax.random.split(k2)
    bsz2 = 13
    logits2 = jax.nn.sigmoid(jax.random.normal(k3, (bsz2, num_labels), jnp.float32))
    labels2 = (jax.random.uniform(k4, (bsz2, num_labels)) > 0.5).astype(jnp.float32)
    loss2 = jax.block_until_ready(module(logits2, labels2))
    ref2 = ref_bce(logits2, labels2)
    assert jnp.allclose(loss2, ref2, rtol=1e-5, atol=1e-5), (loss2, ref2)

    print("KERNEL_OK")
</pallas_src>

<mosaic_0001>
module attributes {stable_mosaic.version = 11 : i64} {
  func.func @_bce_mean_kernel(%arg0: i32, %arg1: memref<16x128xf32, #tpu.memory_space<vmem>>, %arg2: memref<16x128xf32, #tpu.memory_space<vmem>>, %arg3: memref<1x1xf32, #tpu.memory_space<smem>>, %arg4: memref<1x128xf32, #tpu.memory_space<vmem>>) attributes {dimension_semantics = [#tpu.dimension_semantics<arbitrary>], iteration_bounds = array<i64: 1>, scalar_prefetch = 0 : i64, scratch_operands = 1 : i64, tpu.core_type = #tpu.core_type<tc>, window_params = [{transform_indices = @transform_0, window_bounds = array<i64: 16, 128>}, {transform_indices = @transform_1, window_bounds = array<i64: 16, 128>}, {transform_indices = @transform_2, window_bounds = array<i64: 1, 1>}]} {
    %c0_i32 = arith.constant 0 : i32
    %0 = arith.cmpi eq, %arg0, %c0_i32 : i32
    %1 = arith.extui %0 : i1 to i32
    %c0_i32_0 = arith.constant 0 : i32
    %2 = arith.cmpi ne, %1, %c0_i32_0 : i32
    scf.if %2 {
      %cst_15 = arith.constant 0.000000e+00 : f32
      %28 = vector.broadcast %cst_15 : f32 to vector<1x128xf32>
      %c0_16 = arith.constant 0 : index
      %c0_17 = arith.constant 0 : index
      %29 = vector.load %arg4[%c0_16, %c0_17] : memref<1x128xf32, #tpu.memory_space<vmem>>, vector<1x128xf32>
      tpu.vector_store %arg4[%c0_16, %c0_17], %28 {strides = array<i32>} : memref<1x128xf32, #tpu.memory_space<vmem>>, vector<1x128xf32>,
    } else {
    }
    %c0 = arith.constant 0 : index
    %c0_1 = arith.constant 0 : index
    %3 = vector.load %arg1[%c0, %c0_1] : memref<16x128xf32, #tpu.memory_space<vmem>>, vector<16x128xf32>
    %c0_2 = arith.constant 0 : index
    %c0_3 = arith.constant 0 : index
    %4 = vector.load %arg2[%c0_2, %c0_3] : memref<16x128xf32, #tpu.memory_space<vmem>>, vector<16x128xf32>
    %5 = math.log %3 : vector<16x128xf32>
    %cst = arith.constant -1.000000e+02 : f32
    %6 = vector.broadcast %cst : f32 to vector<16x128xf32>
    %7 = arith.maximumf %5, %6 : vector<16x128xf32>
    %cst_4 = arith.constant 1.000000e+00 : f32
    %8 = vector.broadcast %cst_4 : f32 to vector<16x128xf32>
    %9 = arith.subf %8, %3 : vector<16x128xf32>
    %10 = math.log %9 : vector<16x128xf32>
    %cst_5 = arith.constant -1.000000e+02 : f32
    %11 = vector.broadcast %cst_5 : f32 to vector<16x128xf32>
    %12 = arith.maximumf %10, %11 : vector<16x128xf32>
    %13 = arith.mulf %4, %7 : vector<16x128xf32>
    %cst_6 = arith.constant 1.000000e+00 : f32
    %14 = vector.broadcast %cst_6 : f32 to vector<16x128xf32>
    %15 = arith.subf %14, %4 : vector<16x128xf32>
    %16 = arith.mulf %15, %12 : vector<16x128xf32>
    %17 = arith.addf %13, %16 : vector<16x128xf32>
    %cst_7 = arith.constant 0.000000e+00 : f32
    %18 = vector.broadcast %cst_7 : f32 to vector<16x128xf32>
    %19 = arith.subf %18, %17 : vector<16x128xf32>
    %c0_8 = arith.constant 0 : index
    %c0_9 = arith.constant 0 : index
    %20 = vector.load %arg4[%c0_8, %c0_9] : memref<1x128xf32, #tpu.memory_space<vmem>>, vector<1x128xf32>
    %cst_10 = arith.constant dense<0.000000e+00> : vector<128xf32>
    %21 = vector.multi_reduction <add>, %19, %cst_10 [0] : vector<16x128xf32> to vector<128xf32>
    %22 = vector.shape_cast %21 : vector<128xf32> to vector<1x128xf32>
    %23 = arith.addf %20, %22 : vector<1x128xf32>
    %c0_11 = arith.constant 0 : index
    %c0_12 = arith.constant 0 : index
    %24 = vector.load %arg4[%c0_11, %c0_12] : memref<1x128xf32, #tpu.memory_space<vmem>>, vector<1x128xf32>
    tpu.vector_store %arg4[%c0_11, %c0_12], %23 {strides = array<i32>} : memref<1x128xf32, #tpu.memory_space<vmem>>, vector<1x128xf32>,
    %c0_i32_13 = arith.constant 0 : i32
    %25 = arith.cmpi eq, %arg0, %c0_i32_13 : i32
    %26 = arith.extui %25 : i1 to i32
    %c0_i32_14 = arith.constant 0 : i32
    %27 = arith.cmpi ne, %26, %c0_i32_14 : i32
    scf.if %27 {
      %c0_15 = arith.constant 0 : index
      %c0_16 = arith.constant 0 : index
      %28 = vector.load %arg4[%c0_15, %c0_16] : memref<1x128xf32, #tpu.memory_space<vmem>>, vector<1x128xf32>
      %29 = vector.shape_cast %28 : vector<1x128xf32> to vector<1x1x128xf32>
      %cst_17 = arith.constant dense<0.000000e+00> : vector<1xf32>
      %30 = vector.multi_reduction <add>, %29, %cst_17 [1, 2] : vector<1x1x128xf32> to vector<1xf32>
      %31 = vector.shape_cast %30 : vector<1xf32> to vector<1x1x1xf32>
      %32 = vector.extract %31[0, 0, 0] : f32 from vector<1x1x1xf32>
      %cst_18 = arith.constant 2.048000e+03 : f32
      %33 = arith.divf %32, %cst_18 : f32
      %c0_19 = arith.constant 0 : index
      %c0_20 = arith.constant 0 : index
      %34 = memref.load %arg3[%c0_19, %c0_20] : memref<1x1xf32, #tpu.memory_space<smem>>
      memref.store %33, %arg3[%c0_19, %c0_20] : memref<1x1xf32, #tpu.memory_space<smem>>
    } else {
    }
    return
  }
  func.func @transform_0(%arg0: i32) -> (i32, i32) {
    %c0_i32 = arith.constant 0 : i32
    %c0_i32_0 = arith.constant 0 : i32
    return %arg0, %c0_i32 : i32, i32
  }
  func.func @transform_1(%arg0: i32) -> (i32, i32) {
    %c0_i32 = arith.constant 0 : i32
    %c0_i32_0 = arith.constant 0 : i32
    return %arg0, %c0_i32 : i32, i32
  }
  func.func @transform_2(%arg0: i32) -> (i32, i32) {
    %c0_i32 = arith.constant 0 : i32
    %c0_i32_0 = arith.constant 0 : i32
    %c0_i32_1 = arith.constant 0 : i32
    return %c0_i32, %c0_i32_0 : i32, i32
  }
}

</mosaic_0001>

<bundles_post_ra>
// kernel: tpu_custom_call.1
= control target key start
LH: loop header
LB: loop body
LE: loop exit
PB: predicated region body
PF: predicated region fallthrough
CT: control target
= control target key end

     0   :  { %7 = vsyncpa [#allocation4], 0  ;;  %s248_s0 = inlined_call_operand.hbm [shape: f32[16,128], index: 0, kind: input, shape index: {}]   ;;  %s249_s1 = inlined_call_operand.hbm [shape: f32[16,128], index: 1, kind: input, shape index: {}]   ;;  %s250_s2 = inlined_call_operand.hbm [shape: f32[1,1], index: 2, kind: output, shape index: {}]  }
   0x1   :  { %8 = vsyncpa [#allocation7], 0 }
   0x2   :  { %9 = vsyncpa [#allocation5], 0  ;;  %s14_s11 = sshll.u32 %s248_s0, 4  ;;  %s217_s12 = smov [#allocation3]   ;;  %s15_s11 = int_to_ptr.hbm [resolvable:$true] %s14_s11 }
   0x3   :  { %s16_s13 = sshll.u32 %s217_s12, 4  ;;  %s27_s16 = sshll.u32 %s249_s1, 4  ;;  %s17_s13 = int_to_ptr.vmem [resolvable:$true] %s16_s13  ;;  %s28_s16 = int_to_ptr.hbm [resolvable:$true] %s27_s16 }
   0x4   :  { %s218_s17 = smov 128   ;;  %s219_s18 = smov 8  }
   0x5   :  { %22 = dma.hbm_to_vmem [thread:$0]  %s15_s11, 256, %s17_s13, [#allocation4], %s218_s17, %s218_s17, %s219_s18  }
   0x6   :  { %s220_s19 = smov [#allocation6]  }
   0x7   :  { %s29_s20 = sshll.u32 %s220_s19, 4  ;;  %s30_s20 = int_to_ptr.vmem [resolvable:$true] %s29_s20 }
   0x8   :  { %35 = dma.hbm_to_vmem [thread:$0]  %s28_s16, 256, %s30_s20, [#allocation7], %s218_s17, %s218_s17, %s219_s18  }
   0x9   :  { %211 = dma.done.wait [#allocation4], 256  }
   0xa   :  { %212 = vsyncadd [#allocation4], 4294967040 }
   0xb   :  { %213 = dma.done.wait [#allocation7], 256  }
   0xc   :  { %214 = vsyncadd [#allocation7], 4294967040  ;;  %v221_v0 = vmov 0.0   ;;  %v49_v1 = vld [vmem:[#allocation3] sm:$0xff]  ;;  %v50_v2 = vld [vmem:[#allocation3 + $0x8] sm:$0xff]  ;;  %vm91_vm0 = vcmask 1040384  }
   0xd   :  { %48 = vst [vmem:[#allocation2] sm:$0x1] %v221_v0  ;;  %141 = vlog2.f32 %v49_v1  ;;  %v59_v3 = vsub.f32 1.0, %v49_v1  ;;  %v60_v4 = vsub.f32 1.0, %v50_v2  ;;  %v51_v6 = vld [vmem:[#allocation6] sm:$0xff]  ;;  %v52_v8 = vld [vmem:[#allocation6 + $0x8] sm:$0xff] }
   0xe   :  { %143 = vlog2.f32 %v50_v2  ;;  %v69_v15 = vsub.f32 1.0, %v51_v6  ;;  %v70_v18 = vsub.f32 1.0, %v52_v8  ;;  %v222_v40 = vmov 2048.0   ;;  %s118_s21 = sshll.u32 %s250_s2, 4  ;;  %s223_s25 = smov [#allocation8]   ;;  %s119_s21 = int_to_ptr.hbm [resolvable:$true] %s118_s21 }
   0xf   :  { %145 = vlog2.f32 %v59_v3 }
  0x10   :  { %147 = vlog2.f32 %v60_v4 }
  0x11   :  { %149 = vrcp.f32 %v222_v40 }
  0x13   :  { %v142_v5 = vpop.eup %141 }
  0x14   :  { %v144_v7 = vpop.eup %143  ;;  %v54_v9 = vmul.f32 0.6931472, %v142_v5  ;;  %v77_v35 = vld [vmem:[#allocation2] sm:$0x1] }
  0x15   :  { %v146_v10 = vpop.eup %145  ;;  %v56_v11 = vmul.f32 0.6931472, %v144_v7 }
  0x16   :  { %v148_v12 = vpop.eup %147  ;;  %v57_v13 = vmax.f32 %v54_v9, -100.0  ;;  %v62_v14 = vmul.f32 0.6931472, %v146_v10 }
  0x17   :  { %v58_v16 = vmax.f32 %v56_v11, -100.0  ;;  %v64_v17 = vmul.f32 0.6931472, %v148_v12  ;;  %v150_v41 = vpop.eup %149 }
  0x18   :  { %v65_v19 = vmax.f32 %v62_v14, -100.0  ;;  %v67_v20 = vmul.f32 %v57_v13, %v51_v6  ;;  %v103_v42 = vmul.f32 2048.0, %v150_v41  ;;  %vm107_vm1 = vweird.f32 %v150_v41 }
  0x19   :  { %v66_v21 = vmax.f32 %v64_v17, -100.0  ;;  %v68_v22 = vmul.f32 %v58_v16, %v52_v8 }
  0x1a   :  { %v71_v23 = vmul.f32 %v69_v15, %v65_v19  ;;  %v104_v43 = vsub.f32 1.0, %v103_v42 }
  0x1b   :  { %v72_v24 = vmul.f32 %v70_v18, %v66_v21 }
  0x1c   :  { %v73_v25 = vadd.f32 %v71_v23, %v67_v20  ;;  %v105_v47 = vmul.f32 %v150_v41, %v104_v43 }
  0x1d   :  { %v74_v26 = vadd.f32 %v72_v24, %v68_v22 }
  0x1e   :  { %v75_v27 = vsub.f32 0.0, %v73_v25  ;;  %v106_v50 = vadd.f32 %v150_v41, %v105_v47 }
  0x1f   :  { %v76_v28 = vsub.f32 0.0, %v74_v26 }
  0x20   :  { %v108_v53 = vsel %vm107_vm1, %v150_v41, %v106_v50 }
  0x21   :  { %v78_v29 = vadd.f32 %v76_v28, %v75_v27 }
  0x23   :  { %v79_v30 = vrot.slane %v78_v29, 4 }
  0x25   :  { %v80_v31 = vadd.f32 %v79_v30, %v78_v29 }
  0x27   :  { %v81_v32 = vrot.slane %v80_v31, 2 }
  0x29   :  { %v82_v33 = vadd.f32 %v81_v32, %v80_v31 }
  0x2b   :  { %v83_v34 = vrot.slane %v82_v33, 1 }
  0x2d   :  { %v84_v36 = vadd.f32 %v83_v34, %v82_v33 }
  0x2f   :  { %v85_v37 = vadd.f32 %v84_v36, %v77_v35 }
  0x31   :  { %86 = vst [vmem:[#allocation2] sm:$0x1] %v85_v37 }
  0x38   :  { %v90_v38 = vld [vmem:[#allocation2] sm:$0x1] }
  0x39   :  { %v92_v39 = vsel %vm91_vm0, %v90_v38, 0.0 }
  0x3a   :  { %93 = vadd.xlane.f32.xlu0 %v92_v39 }
  0xad   :  { %v94_v44 = vpop.xlane.xlu0 %93 }
  0xae   :  { %v95_v45 = vrot.slane %v94_v44, 4 }
  0xb0   :  { %v96_v46 = vadd.f32 %v95_v45, %v94_v44 }
  0xb2   :  { %v97_v48 = vrot.slane %v96_v46, 2 }
  0xb4   :  { %v98_v49 = vadd.f32 %v97_v48, %v96_v46 }
  0xb6   :  { %v99_v51 = vrot.slane %v98_v49, 1 }
  0xb8   :  { %v100_v52 = vadd.f32 %v99_v51, %v98_v49 }
  0xba   :  { %130 = vpush %v100_v52 }
  0xbb   :  { %132 = vpush %v108_v53 }
  0xeb   :  { %s131_s22 = spop %130 }
  0xec   :  { %s133_s23 = spop %132 }
  0xed   :  { %s110_s24 = smul.f32 %s133_s23, %s131_s22 }
  0xef   :  { %112 = sst [smem:[#allocation8]] %s110_s24 }
  0xf0   :  { %121 = dma.smem_to_hbm %s223_s25, 16, %s119_s21, [#allocation5]  }
  0xf1   :  { %215 = dma.done.wait [#allocation5], 16  }
  0xf2   :  { %216 = vsyncadd [#allocation5], 4294967280 }
  0xf3   :  { %126 = sfence }
  0xf4   :  { %127 = vsyncpa [#allocation4], 1 }
  0xf5   :  { %128 = vsyncpa [#allocation7], 1 }
  0xf6   :  { %129 = vsyncpa [#allocation5], 1 }

</bundles_post_ra>
